<compile_context>
chip_gen: v7x
topology: tpu7x:2x2x1
jax: 0.10.0
libtpu: 0.0.40
codegen_flags: <defaults>
</compile_context>

<pallas_src>
import math
from copy import deepcopy

import numpy as np
import jax
import jax.numpy as jnp
from jax import lax
from jax.experimental import pallas as pl
from jax.experimental.pallas import tpu as pltpu


def _round_up(n, m):
    return ((n + m - 1) // m) * m


def _vmem():
    return pl.BlockSpec(memory_space=pltpu.MemorySpace.VMEM)


_NEG_BIG = -1e30  # finite "minus infinity" for masked (padded) class logits


# ------------------------------ pooling kernel ------------------------------


def _make_pool_call(B, C, HW):
    """GlobalAvgPool over the spatial dim; runs once per forward()."""
    inv_hw = 1.0 / float(HW)

    def kernel(x_ref, pooled_ref):
        pooled_ref[...] = jnp.sum(x_ref[...], axis=2) * inv_hw   # [B, C]

    return pl.pallas_call(
        kernel,
        out_shape=jax.ShapeDtypeStruct((B, C), jnp.float32),
        in_specs=[_vmem()],
        out_specs=_vmem(),
    )


# --------------------------- fused adapt kernel -----------------------------


def _make_adapt_call(B, C, Kp, K, margin, rho, lr):
    """One fused pallas_call for a full VCT/SAM adaptation step."""

    def kernel(pooled_ref, w_ref, b_ref,
               logits_ref, wout_ref, bout_ref, logits_new_ref, loss2_ref):
        pooled = pooled_ref[...]                                  # [B, C]
        valid = lax.broadcasted_iota(jnp.int32, (B, Kp), 1) < K   # real classes

        def fwd(w, b):
            z = jnp.dot(pooled, w, preferred_element_type=jnp.float32) + b
            zm = jnp.where(valid, z, _NEG_BIG)
            m = jnp.max(zm, axis=1, keepdims=True)
            zs = zm - m
            lse = jnp.log(jnp.sum(jnp.exp(zs), axis=1, keepdims=True))
            logp = zs - lse
            p = jnp.exp(logp)
            ent = -jnp.sum(jnp.where(valid, p * logp, 0.0),
                           axis=1, keepdims=True)                 # [B, 1]
            return z, p, logp, ent

        def grads(p, logp, ent, wts):
            # dH/dz_j = -p_j * (log p_j + H); weighted mean over kept samples
            dz = jnp.where(valid, -p * (logp + ent) * wts, 0.0)   # [B, Kp]
            gw = lax.dot_general(pooled, dz, (((0,), (0,)), ((), ())),
                                 preferred_element_type=jnp.float32)  # [C, Kp]
            gb = jnp.sum(dz, axis=0, keepdims=True)               # [1, Kp]
            return gw, gb

        w0 = w_ref[...]
        b0 = b_ref[...]

        # ---- forward 1 (original params) + entropy filter + grads ----------
        z1, p1, logp1, ent1 = fwd(w0, b0)
        logits_ref[...] = z1
        mask1 = (ent1 < margin).astype(jnp.float32)               # [B, 1]
        cnt1 = jnp.sum(mask1, axis=0, keepdims=True)              # [1, 1]
        # guard: empty filter -> zero gradient (reference would NaN params)
        wts1 = mask1 / jnp.maximum(cnt1, 1.0)
        gw1, gb1 = grads(p1, logp1, ent1, wts1)

        # ---- SAM first_step: climb to the local worst-case point -----------
        sq = jnp.sum(gw1 * gw1, axis=0, keepdims=True) + gb1 * gb1  # [1, Kp]
        gnorm = jnp.sqrt(jnp.sum(sq, axis=1, keepdims=True))        # [1, 1]
        scale = rho / (gnorm + 1e-12)
        w1 = w0 + gw1 * scale
        b1 = b0 + gb1 * scale

        # ---- forward 2 (perturbed params) + second filter + grads ----------
        z2, p2, logp2, ent2 = fwd(w1, b1)
        mask2 = mask1 * (ent2 < margin).astype(jnp.float32)       # [B, 1]
        cnt2 = jnp.sum(mask2, axis=0, keepdims=True)              # [1, 1]
        # matches the reference exactly: NaN when nothing passes (the host
        # isnan guard then skips the EMA update)
        loss2_ref[...] = jnp.sum(ent2 * mask2, axis=0, keepdims=True) / cnt2
        wts2 = mask2 / jnp.maximum(cnt2, 1.0)
        gw2, gb2 = grads(p2, logp2, ent2, wts2)

        # ---- SAM second_step: restore params, then base SGD update ---------
        wn = w0 - lr * gw2
        bn = b0 - lr * gb2
        wout_ref[...] = wn
        bout_ref[...] = bn
        # post-update logits: lets the common (no-reset) final forward path
        # skip a separate kernel launch entirely.
        logits_new_ref[...] = (
            jnp.dot(pooled, wn, preferred_element_type=jnp.float32) + bn)

    return pl.pallas_call(
        kernel,
        out_shape=(
            jax.ShapeDtypeStruct((B, Kp), jnp.float32),   # logits @ original W,b
            jax.ShapeDtypeStruct((C, Kp), jnp.float32),   # updated W
            jax.ShapeDtypeStruct((1, Kp), jnp.float32),   # updated b
            jax.ShapeDtypeStruct((B, Kp), jnp.float32),   # logits @ updated W,b
            jax.ShapeDtypeStruct((1, 1), jnp.float32),    # loss_second
        ),
        in_specs=[_vmem(), _vmem(), _vmem()],
        out_specs=(_vmem(), _vmem(), _vmem(), _vmem(), _vmem()),
    )


def _make_forward_call(B, C, Kp):
    """Standalone inference forward (only needed on the post-reset path)."""

    def kernel(pooled_ref, w_ref, b_ref, logits_ref):
        logits_ref[...] = (
            jnp.dot(pooled_ref[...], w_ref[...],
                    preferred_element_type=jnp.float32) + b_ref[...])

    return pl.pallas_call(
        kernel,
        out_shape=jax.ShapeDtypeStruct((B, Kp), jnp.float32),
        in_specs=[_vmem(), _vmem(), _vmem()],
        out_specs=_vmem(),
    )


# ------------------------------ VCT wrapper ---------------------------------


def update_ema(ema, new_data):
    if ema is None:
        return new_data
    return 0.9 * ema + 0.1 * new_data


class VCTPallas:
    """JAX/Pallas port of the VCT test-time adaptation wrapper.

    Optimizer = SAM(rho) around plain SGD(lr), matching the SAM
    first_step / second_step protocol used by forward_and_adapt_vct.
    EMA / reset bookkeeping is host-side Python (float / None), exactly as in
    the reference; only one host sync happens per step, after the fused
    kernel has been dispatched.
    """

    def __init__(self, w, b, lr=1e-3, rho=0.05, steps=1, episodic=False,
                 margin_e0=0.4 * math.log(1000), reset_constant_em=0.2):
        assert steps > 0, "VCT requires >= 1 step(s) to forward and update"
        w = np.asarray(w, np.float32)
        b = np.asarray(b, np.float32).reshape(1, -1)
        self.C, self.K = w.shape
        # lane-dense padded class dimension (padding stays zero & is masked)
        self.Kp = max(_round_up(self.K, 128), 128)
        wp = np.zeros((self.C, self.Kp), np.float32)
        wp[:, : self.K] = w
        bp = np.zeros((1, self.Kp), np.float32)
        bp[:, : self.K] = b
        self.w = jnp.asarray(wp)
        self.b = jnp.asarray(bp)

        self.lr = float(lr)
        self.rho = float(rho)
        self.steps = steps
        self.episodic = episodic
        self.margin_e0 = float(margin_e0)
        self.reset_constant_em = float(reset_constant_em)
        self.ema = None
        # copy_model_and_optimizer (SGD/SAM carry no state beyond the params)
        self.model_state = (deepcopy(wp), deepcopy(bp))

        self._pool_cache = {}
        self._adapt_cache = {}
        self._fwd_cache = {}

    # ---- load_model_and_optimizer ----
    def reset(self):
        if self.model_state is None:
            raise Exception("cannot reset without saved model/optimizer state")
        self.w = jnp.asarray(self.model_state[0])
        self.b = jnp.asarray(self.model_state[1])
        self.ema = None

    def _get_pool(self, B, HW):
        key = (B, HW)
        if key not in self._pool_cache:
            self._pool_cache[key] = _make_pool_call(B, self.C, HW)
        return self._pool_cache[key]

    def _get_adapt(self, B):
        if B not in self._adapt_cache:
            self._adapt_cache[B] = _make_adapt_call(
                B, self.C, self.Kp, self.K, self.margin_e0, self.rho, self.lr)
        return self._adapt_cache[B]

    def _get_forward(self, B):
        if B not in self._fwd_cache:
            self._fwd_cache[B] = _make_forward_call(B, self.C, self.Kp)
        return self._fwd_cache[B]

    # ---- forward (mirrors VCT.forward + forward_and_adapt_vct) ----
    def forward(self, x):
        x = jnp.asarray(x, jnp.float32)
        B, C, H, W = x.shape
        assert C == self.C
        HW = H * W
        x3 = jnp.reshape(x, (B, C, HW))   # free view of contiguous NCHW

        if self.episodic:
            self.reset()

        # spatial pooling is (W,b)-independent: x is read from HBM exactly
        # once per forward(), regardless of the number of adapt steps.
        pooled = self._get_pool(B, HW)(x3)

        adapt = self._get_adapt(B)
        logits_final = None
        for _ in range(self.steps):
            logits1, w_new, b_new, logits_new, loss2 = adapt(
                pooled, self.w, self.b)
            self.w, self.b = w_new, b_new
            logits_final = logits_new

            # single host sync per step (after the fused kernel is dispatched)
            ls = float(jax.device_get(loss2)[0, 0])
            ema = self.ema
            if not np.isnan(ls):
                ema = update_ema(ema, ls)
            reset_flag = False
            if ema is not None and ema < self.reset_constant_em:
                print("ema < 0.2, now reset the model")
                reset_flag = True
            if reset_flag:
                self.reset()
                logits_final = None   # final forward must use the reset params
            self.ema = ema

        if logits_final is None:
            # only hit after a reset: recompute with the restored params
            logits_final = self._get_forward(B)(pooled, self.w, self.b)

        # TODO(synk): original VCT zeroes the wrapped ViT's 'instance_token'
        # parameter; this synthetic linear classifier has no such parameter.
        return logits_final[:, : self.K]


# --------------------------------- main --------------------------------------

if __name__ == "__main__":
    key = jax.random.PRNGKey(0)
    kx, kw, kb = jax.random.split(key, 3)

    B, C, H, W, K = 2, 4, 16, 16, 16
    x = jax.random.normal(kx, (B, C, H, W), dtype=jnp.float32)
    # Deterministic synthetic classifier weights; scaled so pooled features
    # produce logits with enough spread for the entropy filter
    # (margin = 0.4*log(1000) ~= 2.76 vs uniform-16 entropy ~= 2.77).
    w0 = jax.random.normal(kw, (C, K), dtype=jnp.float32) * 30.0
    b0 = jax.random.normal(kb, (K,), dtype=jnp.float32) * 0.1

    vct = VCTPallas(w0, b0, lr=1e-3, rho=0.05, steps=1, episodic=False)
    out = vct.forward(x)
    out = jax.block_until_ready(out)
    assert out.shape == (B, K) and out.dtype == jnp.float32
    assert bool(jnp.all(jnp.isfinite(out)))
    print("KERNEL_OK")
</pallas_src>

<mosaic_0001>
module attributes {stable_mosaic.version = 11 : i64} {
  func.func @kernel(%arg0: memref<2x4x256xf32, #tpu.memory_space<vmem>>, %arg1: memref<2x4xf32, #tpu.memory_space<vmem>>) attributes {dimension_semantics = [], scalar_prefetch = 0 : i64, scratch_operands = 0 : i64, tpu.core_type = #tpu.core_type<tc>} {
    %c0 = arith.constant 0 : index
    %c0_0 = arith.constant 0 : index
    %c0_1 = arith.constant 0 : index
    %0 = vector.load %arg0[%c0, %c0_0, %c0_1] : memref<2x4x256xf32, #tpu.memory_space<vmem>>, vector<2x4x256xf32>
    %cst = arith.constant dense<0.000000e+00> : vector<2x4xf32>
    %1 = vector.multi_reduction <add>, %0, %cst [2] : vector<2x4x256xf32> to vector<2x4xf32>
    %cst_2 = arith.constant 3.906250e-03 : f32
    %2 = vector.broadcast %cst_2 : f32 to vector<2x4xf32>
    %3 = arith.mulf %1, %2 : vector<2x4xf32>
    %c0_3 = arith.constant 0 : index
    %c0_4 = arith.constant 0 : index
    %4 = vector.load %arg1[%c0_3, %c0_4] : memref<2x4xf32, #tpu.memory_space<vmem>>, vector<2x4xf32>
    tpu.vector_store %arg1[%c0_3, %c0_4], %3 {strides = array<i32>} : memref<2x4xf32, #tpu.memory_space<vmem>>, vector<2x4xf32>,
    return
  }
}

</mosaic_0001>

<bundles_post_ra>
// kernel: tpu_custom_call.1
= control target key start
LH: loop header
LB: loop body
LE: loop exit
PB: predicated region body
PF: predicated region fallthrough
CT: control target
= control target key end

     0   :  { %6 = vsyncpa [#allocation3], 0  ;;  %s168_s0 = inlined_call_operand.hbm [shape: f32[2,4,256], index: 0, kind: input, shape index: {}]   ;;  %s169_s1 = inlined_call_operand.hbm [shape: f32[2,4], index: 1, kind: output, shape index: {}]  }
   0x1   :  { %7 = vsyncpa [#allocation4], 0  ;;  %s130_s6 = smov [#allocation2]   ;;  %s82_s10 = scalar_lea.hbm %s168_s0, 256 }
   0x2   :  { %s13_s7 = sshll.u32 %s130_s6, 4  ;;  %p83_p0 = scmp.ne.s32.totalorder %s168_s0, %s82_s10  ;;  %s14_s7 = int_to_ptr.vmem [resolvable:$true] %s13_s7 }
   0x3   :  { %p86_p1 = scmp.lt.u32.totalorder %s82_s10, %s168_s0 }
   0x5   :  { %p88_p2 = pnand %p86_p1, %p83_p0 }
   0x7   :  { %91 = shalt.err (!%p88_p2)
}
   0x8   :  { %s92_s15 = scalar_lea.vmem %s14_s7, 256  ;;  %p97_p4 = scmp.lt.s32.totalorder %s14_s7, %s14_s7 }
   0x9   :  { %p93_p3 = scmp.ne.s32.totalorder %s14_s7, %s92_s15  ;;  %p98_p5 = scmp.lt.s32.totalorder %s92_s15, %s92_s15 }
   0xb   :  { %p99_p6 = por %p98_p5, %p97_p4 }
   0xd   :  { %p100_p7 = pnand %p99_p6, %p93_p3 }
   0xf   :  { %103 = shalt.err (!%p100_p7)
}
  0x10   :  { %s131_s16 = smov 128   ;;  %s132_s17 = smov 8  }
  0x11   :  { %19 = dma.hbm_to_vmem [thread:$0]  %s168_s0, 256, %s14_s7, [#allocation3], %s131_s16, %s131_s16, %s132_s17  }
  0x12   :  { %126 = dma.done.wait [#allocation3], 256  }
  0x13   :  { %127 = vsyncadd [#allocation3], 4294967040  ;;  %vm31_vm0 = vcmask 1043456   ;;  %v23_v0 = vld [vmem:[#allocation2] sm:$0xff]  ;;  %v24_v1 = vld [vmem:[#allocation2 + $0x8] sm:$0xff]  ;;  %v46_v10 = vlaneseq  ;;  %s133_s0 = smov [#allocation5]  }
  0x14   :  { %v27_v2 = vcombine.high %v23_v0, %v23_v0  ;;  %v32_v3 = vsel %vm31_vm0, %v23_v0, 0.0  ;;  %v28_v4 = vcombine.high %v24_v1, %v24_v1  ;;  %v37_v6 = vsel %vm31_vm0, %v24_v1, 0.0  ;;  %s67_s20 = sshll.u32 %s133_s0, 4  ;;  %s68_s20 = int_to_ptr.vmem [resolvable:$true] %s67_s20 }
  0x15   :  { %v47_v11 = vand.u32 127, %v46_v10  ;;  %v49_v12 = vshrl.u32 %v46_v10, 7  ;;  %vm56_vm1 = vcmask 1041409   ;;  %vm59_vm2 = vcmask 25600   ;;  %s104_s21 = scalar_lea.vmem %s68_s20, 32  ;;  %p109_p9 = scmp.lt.s32.totalorder %s68_s20, %s68_s20 }
  0x16   :  { %v33_v5 = vsel %vm31_vm0, %v27_v2, 0.0  ;;  %v38_v7 = vsel %vm31_vm0, %v28_v4, 0.0  ;;  %p105_p8 = scmp.ne.s32.totalorder %s68_s20, %s104_s21  ;;  %p110_p10 = scmp.lt.s32.totalorder %s104_s21, %s104_s21 }
  0x17   :  { %v34_v8 = vadd.f32 %v33_v5, %v32_v3  ;;  %v39_v9 = vadd.f32 %v38_v7, %v37_v6  ;;  %v50_v14 = vsub.s32 %v47_v11, %v49_v12 }
  0x18   :  { %p111_p11 = por %p110_p10, %p109_p9 }
  0x19   :  { %35 = vadd.xlane.f32.xlu0 %v34_v8 }
  0x1a   :  { %p112_p12 = pnand %p111_p11, %p105_p8 }
  0x1d   :  { %40 = vadd.xlane.f32.xlu0 %v39_v9 }
  0xa6   :  { %v36_v13 = vpop.xlane.xlu0 %35 }
  0xa7   :  { %v42_v15 = vmul.f32 0.00390625, %v36_v13 }
  0xa9   :  { %v51_v18 = vrot.slane %v42_v15, %v50_v14 }
  0xaa   :  { %v41_v16 = vpop.xlane.xlu0 %40 }
  0xab   :  { %v43_v17 = vmul.f32 0.00390625, %v41_v16 }
  0xad   :  { %v55_v19 = vrot.slane %v43_v17, %v50_v14 }
  0xaf   :  { %v57_v20 = vsel %vm56_vm1, %v55_v19, %v51_v18 }
  0xb0   :  { %60 = vst.msk [vmem:[#allocation5] sm:$0x3] %vm59_vm2, %v57_v20 }
  0xb1   :  { %115 = shalt.err (!%p112_p12)
}
  0xb2   :  { %s116_s24 = scalar_lea.hbm %s169_s1, 32 }
  0xb3   :  { %p117_p13 = scmp.ne.s32.totalorder %s169_s1, %s116_s24  ;;  %p120_p0 = scmp.lt.u32.totalorder %s116_s24, %s169_s1 }
  0xb5   :  { %p122_p1 = pnand %p120_p0, %p117_p13 }
  0xb7   :  { %125 = shalt.err (!%p122_p1)
}
  0xb8   :  { %70 = dma.vmem_to_hbm [thread:$0]  %s68_s20, 32, %s169_s1, [#allocation4]  }
  0xb9   :  { %128 = dma.done.wait [#allocation4], 32  }
  0xba   :  { %129 = vsyncadd [#allocation4], 4294967264 }
  0xbb   :  { %74 = vsyncpa [#allocation3], 1 }
  0xbc   :  { %75 = vsyncpa [#allocation4], 1 }

</bundles_post_ra>
